<compile_context>
chip_gen: v6e
topology: v6e:2x2x1
jax: 0.10.0
libtpu: 0.0.40
codegen_flags: <defaults>
</compile_context>

<pallas_src>
import jax
import jax.numpy as jnp
from jax.experimental import pallas as pl
from jax.experimental.pallas import tpu as pltpu

EPS = 1e-5
LANE = 128          # lane (last-dim) granularity
SUBLANE = 8         # f32 sublane granularity
MAX_TILE_ROWS = 2048  # large tiles amortize the ~0.35 us per-grid-step overhead


def _round_up(x, m):
    return ((x + m - 1) // m) * m


def _pad2d(a, rows, cols):
    return jnp.pad(a, ((0, rows - a.shape[0]), (0, cols - a.shape[1])))


def _vmem_limit_bytes():
    """Generation-aware scoped-VMEM budget (v7x: 64 MiB/TC, v5e/v6e: 128 MiB)."""
    cap = 64 * 1024 * 1024  # conservative fallback = v7x per-TensorCore capacity
    try:
        cap = int(getattr(pltpu.get_tpu_info(), "vmem_capacity_bytes", cap))
    except Exception:
        pass
    cap = min(max(cap, 32 * 1024 * 1024), 128 * 1024 * 1024)
    return (cap * 3) // 4   # headroom for compiler-internal scratch / double-buffering


# ---------------- Kernels -------------------------------------------------------------

def _build_stats_kernel(n_actual, tile_n, matmul_dtype):
    """Pass 1: accumulate per-feature sum / sum-of-squares of h = x @ W + b across batch
    tiles; at the last grid step fold BN into a single (scale, shift) pair."""
    inv_n = 1.0 / n_actual
    # torch.var default is unbiased (N-1); N == 1 gives NaN in torch, mirror that.
    inv_nm1 = (1.0 / (n_actual - 1)) if n_actual > 1 else float("nan")

    def kernel(x_ref, w_ref, b_ref, g_ref, be_ref, scale_ref, shift_ref,
               sum_ref, sumsq_ref):
        t = pl.program_id(0)

        @pl.when(t == 0)
        def _():
            sum_ref[...] = jnp.zeros_like(sum_ref)
            sumsq_ref[...] = jnp.zeros_like(sumsq_ref)

        h = jnp.dot(x_ref[...].astype(matmul_dtype), w_ref[...],
                    preferred_element_type=jnp.float32) + b_ref[...]   # (tile, D) f32

        # Row-validity mask (drops zero-padded batch rows) as an (8, tile) row vector;
        # the axis-0 reductions become MXU matmuls (all 8 result rows identical) instead
        # of VPU/XLU cross-sublane reduces, and the padded-row correction is free.
        col = jax.lax.broadcasted_iota(jnp.int32, (SUBLANE, tile_n), 1)
        valid = (col < (n_actual - t * tile_n)).astype(jnp.float32)
        sum_ref[...] += jnp.dot(valid, h, preferred_element_type=jnp.float32)
        sumsq_ref[...] += jnp.dot(valid, h * h, preferred_element_type=jnp.float32)

        @pl.when(t == pl.num_programs(0) - 1)
        def _():
            mean = sum_ref[0:1, :] * inv_n
            var = (sumsq_ref[0:1, :] - n_actual * mean * mean) * inv_nm1
            scale = g_ref[...] * jax.lax.rsqrt(var + EPS)   # gamma folded into rsqrt
            scale_ref[...] = scale
            shift_ref[...] = be_ref[...] - mean * scale

    return kernel


def _build_apply_kernel(fuse_final, matmul_dtype):
    """Pass 2: recompute h, normalize+affine in one FMA, ReLU; optionally fuse the final
    Linear so the last activation never round-trips HBM."""
    if fuse_final:
        def kernel(x_ref, w_ref, b_ref, scale_ref, shift_ref, wf_ref, bf_ref, o_ref):
            h = jnp.dot(x_ref[...].astype(matmul_dtype), w_ref[...],
                        preferred_element_type=jnp.float32) + b_ref[...]
            act = jnp.maximum(h * scale_ref[...] + shift_ref[...], 0.0)
            o_ref[...] = (jnp.dot(act.astype(matmul_dtype), wf_ref[...],
                                  preferred_element_type=jnp.float32)
                          + bf_ref[...]).astype(o_ref.dtype)
    else:
        def kernel(x_ref, w_ref, b_ref, scale_ref, shift_ref, o_ref):
            h = jnp.dot(x_ref[...].astype(matmul_dtype), w_ref[...],
                        preferred_element_type=jnp.float32) + b_ref[...]
            o_ref[...] = jnp.maximum(h * scale_ref[...] + shift_ref[...],
                                     0.0).astype(o_ref.dtype)
    return kernel


def _linear_kernel_builder(matmul_dtype):
    def kernel(x_ref, w_ref, b_ref, o_ref):
        o_ref[...] = (jnp.dot(x_ref[...].astype(matmul_dtype), w_ref[...],
                              preferred_element_type=jnp.float32) + b_ref[...])
    return kernel


# ---------------- Parameter prep (once, outside the hot path) --------------------------

def prepare_params(hidden_params, final_params, matmul_dtype=jnp.float32):
    """Zero-pad parameters to lane-dense (multiple-of-128) feature dims and pre-cast
    weights to the matmul dtype (halves weight DMA / VMEM for bf16)."""
    md = jnp.dtype(matmul_dtype)
    hidden_p = []
    for (w_t, b, gamma, beta) in hidden_params:
        d_in, d_out = w_t.shape
        dip, dop = _round_up(d_in, LANE), _round_up(d_out, LANE)
        hidden_p.append(dict(
            w=_pad2d(jnp.asarray(w_t, jnp.float32), dip, dop).astype(md),
            b=_pad2d(jnp.asarray(b, jnp.float32).reshape(1, -1), 1, dop),
            gamma=_pad2d(jnp.asarray(gamma, jnp.float32).reshape(1, -1), 1, dop),
            beta=_pad2d(jnp.asarray(beta, jnp.float32).reshape(1, -1), 1, dop),
            d_in_pad=dip, d_out_pad=dop))
    w_t, b = final_params
    d_in, d_out = w_t.shape
    dip, dop = _round_up(d_in, LANE), _round_up(d_out, LANE)
    final_p = dict(
        w=_pad2d(jnp.asarray(w_t, jnp.float32), dip, dop).astype(md),
        b=_pad2d(jnp.asarray(b, jnp.float32).reshape(1, -1), 1, dop),
        d_in_pad=dip, d_out_pad=dop)
    d0 = hidden_params[0][0].shape[0] if hidden_params else final_params[0].shape[0]
    return dict(hidden=hidden_p, final=final_p, d0_pad=_round_up(d0, LANE),
                d_out=d_out, matmul_dtype=md, vmem_limit=_vmem_limit_bytes())


# ---------------- Tile sizing -----------------------------------------------------------

def _choose_tile_n(n, d_in_max, d_out_max, c_pad, pack, w_bytes, vmem_budget,
                   max_tile_rows):
    n_min = _round_up(max(n, 1), pack)
    # Whole-block-resident params (weights + final weights + small vectors), x2 headroom.
    fixed = 2 * (d_in_max * d_out_max * w_bytes + d_out_max * c_pad * w_bytes
                 + 8 * max(d_out_max, c_pad) * 4)
    # Streamed bytes per batch row: x tile + out tile (double-buffered by the pipeline)
    # plus ~2 live f32 intermediates (h, act).
    per_row = 2 * d_in_max * 4 + 2 * max(d_out_max, c_pad) * 4 + 2 * d_out_max * 4
    avail = max(vmem_budget - fixed, per_row * pack)
    tile = min(int(avail // per_row), max_tile_rows)
    if tile >= n_min:
        return n_min                            # whole batch fits one tile
    return max((tile // LANE) * LANE, LANE)     # lane/sublane-aligned multi-tile


# ---------------- pallas_call wrappers ---------------------------------------------------

def _bn_stats_call(x_p, layer, n, tile_n, md, vmem_limit):
    n_pad, d_in_pad = x_p.shape
    d_out_pad = layer["d_out_pad"]
    vec = pl.BlockSpec((1, d_out_pad), lambda t: (0, 0))
    return pl.pallas_call(
        _build_stats_kernel(n, tile_n, md),
        out_shape=(jax.ShapeDtypeStruct((1, d_out_pad), jnp.float32),
                   jax.ShapeDtypeStruct((1, d_out_pad), jnp.float32)),
        grid=(n_pad // tile_n,),
        in_specs=[pl.BlockSpec((tile_n, d_in_pad), lambda t: (t, 0)),
                  pl.BlockSpec((d_in_pad, d_out_pad), lambda t: (0, 0)),
                  vec, vec, vec],
        out_specs=(vec, vec),
        scratch_shapes=[pltpu.VMEM((SUBLANE, d_out_pad), jnp.float32),
                        pltpu.VMEM((SUBLANE, d_out_pad), jnp.float32)],
        compiler_params=pltpu.CompilerParams(
            dimension_semantics=("arbitrary",),      # cross-tile stats reduction
            vmem_limit_bytes=vmem_limit),
    )(x_p, layer["w"], layer["b"], layer["gamma"], layer["beta"])


def _bn_apply_call(x_p, layer, scale, shift, final_layer, tile_n, md, vmem_limit,
                   act_dtype):
    n_pad, d_in_pad = x_p.shape
    d_out_pad = layer["d_out_pad"]
    fuse_final = final_layer is not None
    vec = pl.BlockSpec((1, d_out_pad), lambda t: (0, 0))
    args = [x_p, layer["w"], layer["b"], scale, shift]
    in_specs = [pl.BlockSpec((tile_n, d_in_pad), lambda t: (t, 0)),
                pl.BlockSpec((d_in_pad, d_out_pad), lambda t: (0, 0)),
                vec, vec, vec]
    if fuse_final:
        c_pad = final_layer["d_out_pad"]
        args += [final_layer["w"], final_layer["b"]]
        in_specs += [pl.BlockSpec((d_out_pad, c_pad), lambda t: (0, 0)),
                     pl.BlockSpec((1, c_pad), lambda t: (0, 0))]
        out_cols, out_dt = c_pad, jnp.float32
    else:
        out_cols, out_dt = d_out_pad, act_dtype
    return pl.pallas_call(
        _build_apply_kernel(fuse_final, md),
        out_shape=jax.ShapeDtypeStruct((n_pad, out_cols), out_dt),
        grid=(n_pad // tile_n,),
        in_specs=in_specs,
        out_specs=pl.BlockSpec((tile_n, out_cols), lambda t: (t, 0)),
        compiler_params=pltpu.CompilerParams(
            dimension_semantics=("parallel",),       # megacore-shardable on v7x
            vmem_limit_bytes=vmem_limit),
    )(*args)


# ---------------- Forward ----------------------------------------------------------------

def pt_deep_forward(x, prepared, max_tile_rows=MAX_TILE_ROWS):
    """Forward pass; returns (N, n_classes) float32 logits."""
    x = jnp.asarray(x, jnp.float32)
    n = x.shape[0]
    md = prepared["matmul_dtype"]
    vmem_limit = prepared["vmem_limit"]
    is_bf16 = (md == jnp.dtype(jnp.bfloat16))
    act_dtype = jnp.dtype(jnp.bfloat16) if is_bf16 else jnp.dtype(jnp.float32)
    pack = 16 if is_bf16 else SUBLANE            # bf16 packs 16 rows per vreg

    layers, fin = prepared["hidden"], prepared["final"]
    d_in_max = max([l["d_in_pad"] for l in layers] + [fin["d_in_pad"]])
    d_out_max = max([l["d_out_pad"] for l in layers] + [fin["d_out_pad"]])
    tile_n = _choose_tile_n(n, d_in_max, d_out_max, fin["d_out_pad"], pack,
                            md.itemsize, vmem_limit, max_tile_rows)
    n_pad = _round_up(max(n, 1), tile_n)
    act = _pad2d(x, n_pad, prepared["d0_pad"])

    if not layers:   # degenerate config: single Linear
        out = pl.pallas_call(
            _linear_kernel_builder(md),
            out_shape=jax.ShapeDtypeStruct((n_pad, fin["d_out_pad"]), jnp.float32),
            grid=(n_pad // tile_n,),
            in_specs=[pl.BlockSpec((tile_n, fin["d_in_pad"]), lambda t: (t, 0)),
                      pl.BlockSpec((fin["d_in_pad"], fin["d_out_pad"]),
                                   lambda t: (0, 0)),
                      pl.BlockSpec((1, fin["d_out_pad"]), lambda t: (0, 0))],
            out_specs=pl.BlockSpec((tile_n, fin["d_out_pad"]), lambda t: (t, 0)),
            compiler_params=pltpu.CompilerParams(
                dimension_semantics=("parallel",), vmem_limit_bytes=vmem_limit),
        )(act, fin["w"], fin["b"])
        return out[:n, :prepared["d_out"]]

    for li, layer in enumerate(layers):
        scale, shift = _bn_stats_call(act, layer, n, tile_n, md, vmem_limit)
        last = (li == len(layers) - 1)
        act = _bn_apply_call(act, layer, scale, shift, fin if last else None,
                             tile_n, md, vmem_limit, act_dtype)
    return act[:n, :prepared["d_out"]]


# ---------------- Deterministic init (PTDeep shapes, weights pre-transposed) -------------

def init_pt_deep_params(config, key):
    hidden = []
    for i in range(1, len(config) - 1):
        d_in, d_out = config[i - 1], config[i]
        key, kw, kb = jax.random.split(key, 3)
        w_t = jax.random.normal(kw, (d_in, d_out), jnp.float32) * 0.1
        b = jax.random.normal(kb, (d_out,), jnp.float32) * 0.01
        gamma = jnp.ones((d_out,), jnp.float32)
        beta = jnp.zeros((d_out,), jnp.float32)
        hidden.append((w_t, b, gamma, beta))
    d_in, d_out = config[-2], config[-1]
    key, kw, kb = jax.random.split(key, 3)
    w_t = jax.random.normal(kw, (d_in, d_out), jnp.float32) * 0.1
    b = jax.random.normal(kb, (d_out,), jnp.float32) * 0.01
    return hidden, (w_t, b)


# ---------------- Plain-JAX reference -----------------------------------------------------

def pt_deep_forward_ref(x, hidden_params, final_params):
    x = x.astype(jnp.float32)
    for (w_t, b, gamma, beta) in hidden_params:
        h = x @ w_t + b
        mean = jnp.mean(h, axis=0, keepdims=True)
        var = jnp.sum((h - mean) ** 2, axis=0, keepdims=True) / (h.shape[0] - 1)
        h = (h - mean) / jnp.sqrt(var + EPS)
        h = gamma * h + beta
        x = jnp.maximum(h, 0.0)
    w_t, b = final_params
    return x @ w_t + b


if __name__ == "__main__":
    # config: 16 input features, two hidden layers of 32, 10 classes
    config = [16, 32, 32, 10]

    key = jax.random.PRNGKey(0)
    key, kx = jax.random.split(key)
    hidden_params, final_params = init_pt_deep_params(config, key)

    prepared_f32 = prepare_params(hidden_params, final_params, jnp.float32)
    prepared_bf16 = prepare_params(hidden_params, final_params, jnp.bfloat16)

    # 1) f32 path, batch multiple of 8 (single batch tile).
    x8 = jax.random.normal(kx, (8, config[0]), jnp.float32)
    out8 = jax.block_until_ready(pt_deep_forward(x8, prepared_f32))
    ref8 = pt_deep_forward_ref(x8, hidden_params, final_params)
    assert out8.shape == (8, config[-1])
    assert jnp.allclose(out8, ref8, atol=1e-4, rtol=1e-4), "f32 path mismatch"

    # 2) batch not a multiple of 8 -> exercises masked BN stats over padded rows.
    x6 = x8[:6]
    out6 = jax.block_until_ready(pt_deep_forward(x6, prepared_f32))
    ref6 = pt_deep_forward_ref(x6, hidden_params, final_params)
    assert out6.shape == (6, config[-1])
    assert jnp.allclose(out6, ref6, atol=1e-4, rtol=1e-4), "masked-batch path mismatch"

    # 3) multi-tile batch grid (tile forced small) -> exercises cross-tile stats
    #    accumulation ("arbitrary" axis) and the "parallel" apply pass.
    key, kx2 = jax.random.split(key)
    x300 = jax.random.normal(kx2, (300, config[0]), jnp.float32)
    out300 = jax.block_until_ready(
        pt_deep_forward(x300, prepared_f32, max_tile_rows=128))
    ref300 = pt_deep_forward_ref(x300, hidden_params, final_params)
    assert out300.shape == (300, config[-1])
    assert jnp.allclose(out300, ref300, atol=1e-3, rtol=1e-3), "tiled path mismatch"

    # 4) bf16 matmul operands / bf16-stored intermediates (f32 accumulation & stats).
    outb = jax.block_until_ready(pt_deep_forward(x8, prepared_bf16))
    assert outb.shape == (8, config[-1])
    assert jnp.allclose(outb, ref8, atol=1e-1, rtol=1e-1), "bf16 path mismatch"

    print("KERNEL_OK")
</pallas_src>

<mosaic_0001>
module attributes {stable_mosaic.version = 11 : i64} {
  func.func @kernel(%arg0: i32, %arg1: memref<8x128xf32, #tpu.memory_space<vmem>>, %arg2: memref<128x128xf32, #tpu.memory_space<vmem>>, %arg3: memref<1x128xf32, #tpu.memory_space<vmem>>, %arg4: memref<1x128xf32, #tpu.memory_space<vmem>>, %arg5: memref<1x128xf32, #tpu.memory_space<vmem>>, %arg6: memref<1x128xf32, #tpu.memory_space<vmem>>, %arg7: memref<1x128xf32, #tpu.memory_space<vmem>>, %arg8: memref<8x128xf32, #tpu.memory_space<vmem>>, %arg9: memref<8x128xf32, #tpu.memory_space<vmem>>) attributes {dimension_semantics = [#tpu.dimension_semantics<arbitrary>], iteration_bounds = array<i64: 1>, scalar_prefetch = 0 : i64, scratch_operands = 2 : i64, tpu.core_type = #tpu.core_type<tc>, window_params = [{transform_indices = @transform_0, window_bounds = array<i64: 8, 128>}, {pipeline_mode = #tpu.pipeline_mode<synchronous>, transform_indices = @transform_1, window_bounds = array<i64: 128, 128>}, {pipeline_mode = #tpu.pipeline_mode<synchronous>, transform_indices = @transform_2, window_bounds = array<i64: 1, 128>}, {pipeline_mode = #tpu.pipeline_mode<synchronous>, transform_indices = @transform_3, window_bounds = array<i64: 1, 128>}, {pipeline_mode = #tpu.pipeline_mode<synchronous>, transform_indices = @transform_4, window_bounds = array<i64: 1, 128>}, {pipeline_mode = #tpu.pipeline_mode<synchronous>, transform_indices = @transform_5, window_bounds = array<i64: 1, 128>}, {pipeline_mode = #tpu.pipeline_mode<synchronous>, transform_indices = @transform_6, window_bounds = array<i64: 1, 128>}]} {
    %c0_i32 = arith.constant 0 : i32
    %0 = arith.cmpi eq, %arg0, %c0_i32 : i32
    %1 = arith.extui %0 : i1 to i32
    %c0_i32_0 = arith.constant 0 : i32
    %2 = arith.cmpi ne, %1, %c0_i32_0 : i32
    scf.if %2 {
      %cst_19 = arith.constant 0.000000e+00 : f32
      %28 = vector.broadcast %cst_19 : f32 to vector<8x128xf32>
      %c0_20 = arith.constant 0 : index
      %c0_21 = arith.constant 0 : index
      %29 = vector.load %arg8[%c0_20, %c0_21] : memref<8x128xf32, #tpu.memory_space<vmem>>, vector<8x128xf32>
      tpu.vector_store %arg8[%c0_20, %c0_21], %28 {strides = array<i32>} : memref<8x128xf32, #tpu.memory_space<vmem>>, vector<8x128xf32>,
      %cst_22 = arith.constant 0.000000e+00 : f32
      %30 = vector.broadcast %cst_22 : f32 to vector<8x128xf32>
      %c0_23 = arith.constant 0 : index
      %c0_24 = arith.constant 0 : index
      %31 = vector.load %arg9[%c0_23, %c0_24] : memref<8x128xf32, #tpu.memory_space<vmem>>, vector<8x128xf32>
      tpu.vector_store %arg9[%c0_23, %c0_24], %30 {strides = array<i32>} : memref<8x128xf32, #tpu.memory_space<vmem>>, vector<8x128xf32>,
    } else {
    }
    %c0 = arith.constant 0 : index
    %c0_1 = arith.constant 0 : index
    %3 = vector.load %arg1[%c0, %c0_1] : memref<8x128xf32, #tpu.memory_space<vmem>>, vector<8x128xf32>
    %c0_2 = arith.constant 0 : index
    %c0_3 = arith.constant 0 : index
    %4 = vector.load %arg2[%c0_2, %c0_3] : memref<128x128xf32, #tpu.memory_space<vmem>>, vector<128x128xf32>
    %cst = arith.constant dense<0.000000e+00> : vector<8x128xf32>
    %5 = tpu.matmul %3, %4, %cst {dimension_numbers = #tpu.dot_dimension_numbers<[1], [0], [0], [1], [0, 0, 1, 1], [], []>} : vector<8x128xf32>, vector<128x128xf32>, vector<8x128xf32> -> vector<8x128xf32>
    %c0_4 = arith.constant 0 : index
    %c0_5 = arith.constant 0 : index
    %6 = vector.load %arg3[%c0_4, %c0_5] : memref<1x128xf32, #tpu.memory_space<vmem>>, vector<1x128xf32>
    %7 = vector.broadcast %6 : vector<1x128xf32> to vector<8x128xf32>
    %8 = arith.addf %5, %7 : vector<8x128xf32>
    %9 = tpu.iota {dimensions = array<i32: 1>} : vector<8x8xi32>
    %c8_i32 = arith.constant 8 : i32
    %10 = arith.muli %arg0, %c8_i32 : i32
    %c8_i32_6 = arith.constant 8 : i32
    %11 = arith.subi %c8_i32_6, %10 : i32
    %12 = vector.broadcast %11 : i32 to vector<8x8xi32>
    %13 = arith.cmpi slt, %9, %12 : vector<8x8xi32>
    %14 = arith.extui %13 : vector<8x8xi1> to vector<8x8xi32>
    %15 = arith.sitofp %14 : vector<8x8xi32> to vector<8x8xf32>
    %c0_7 = arith.constant 0 : index
    %c0_8 = arith.constant 0 : index
    %16 = vector.load %arg8[%c0_7, %c0_8] : memref<8x128xf32, #tpu.memory_space<vmem>>, vector<8x128xf32>
    %cst_9 = arith.constant dense<0.000000e+00> : vector<8x128xf32>
    %17 = tpu.matmul %15, %8, %cst_9 {dimension_numbers = #tpu.dot_dimension_numbers<[1], [0], [0], [1], [0, 0, 1, 1], [], []>} : vector<8x8xf32>, vector<8x128xf32>, vector<8x128xf32> -> vector<8x128xf32>
    %18 = arith.addf %16, %17 : vector<8x128xf32>
    %c0_10 = arith.constant 0 : index
    %c0_11 = arith.constant 0 : index
    %19 = vector.load %arg8[%c0_10, %c0_11] : memref<8x128xf32, #tpu.memory_space<vmem>>, vector<8x128xf32>
    tpu.vector_store %arg8[%c0_10, %c0_11], %18 {strides = array<i32>} : memref<8x128xf32, #tpu.memory_space<vmem>>, vector<8x128xf32>,
    %c0_12 = arith.constant 0 : index
    %c0_13 = arith.constant 0 : index
    %20 = vector.load %arg9[%c0_12, %c0_13] : memref<8x128xf32, #tpu.memory_space<vmem>>, vector<8x128xf32>
    %21 = arith.mulf %8, %8 : vector<8x128xf32>
    %cst_14 = arith.constant dense<0.000000e+00> : vector<8x128xf32>
    %22 = tpu.matmul %15, %21, %cst_14 {dimension_numbers = #tpu.dot_dimension_numbers<[1], [0], [0], [1], [0, 0, 1, 1], [], []>} : vector<8x8xf32>, vector<8x128xf32>, vector<8x128xf32> -> vector<8x128xf32>
    %23 = arith.addf %20, %22 : vector<8x128xf32>
    %c0_15 = arith.constant 0 : index
    %c0_16 = arith.constant 0 : index
    %24 = vector.load %arg9[%c0_15, %c0_16] : memref<8x128xf32, #tpu.memory_space<vmem>>, vector<8x128xf32>
    tpu.vector_store %arg9[%c0_15, %c0_16], %23 {strides = array<i32>} : memref<8x128xf32, #tpu.memory_space<vmem>>, vector<8x128xf32>,
    %c0_i32_17 = arith.constant 0 : i32
    %25 = arith.cmpi eq, %arg0, %c0_i32_17 : i32
    %26 = arith.extui %25 : i1 to i32
    %c0_i32_18 = arith.constant 0 : i32
    %27 = arith.cmpi ne, %26, %c0_i32_18 : i32
    scf.if %27 {
      %c0_19 = arith.constant 0 : index
      %c0_20 = arith.constant 0 : index
      %28 = vector.load %arg8[%c0_19, %c0_20] : memref<8x128xf32, #tpu.memory_space<vmem>>, vector<1x128xf32>
      %cst_21 = arith.constant 1.250000e-01 : f32
      %29 = vector.broadcast %cst_21 : f32 to vector<1x128xf32>
      %30 = arith.mulf %28, %29 : vector<1x128xf32>
      %c0_22 = arith.constant 0 : index
      %c0_23 = arith.constant 0 : index
      %31 = vector.load %arg9[%c0_22, %c0_23] : memref<8x128xf32, #tpu.memory_space<vmem>>, vector<1x128xf32>
      %cst_24 = arith.constant 8.000000e+00 : f32
      %32 = vector.broadcast %cst_24 : f32 to vector<1x128xf32>
      %33 = arith.mulf %32, %30 : vector<1x128xf32>
      %34 = arith.mulf %33, %30 : vector<1x128xf32>
      %35 = arith.subf %31, %34 : vector<1x128xf32>
      %cst_25 = arith.constant 0.142857149 : f32
      %36 = vector.broadcast %cst_25 : f32 to vector<1x128xf32>
      %37 = arith.mulf %35, %36 : vector<1x128xf32>
      %c0_26 = arith.constant 0 : index
      %c0_27 = arith.constant 0 : index
      %38 = vector.load %arg4[%c0_26, %c0_27] : memref<1x128xf32, #tpu.memory_space<vmem>>, vector<1x128xf32>
      %cst_28 = arith.constant 9.99999974E-6 : f32
      %39 = vector.broadcast %cst_28 : f32 to vector<1x128xf32>
      %40 = arith.addf %37, %39 : vector<1x128xf32>
      %41 = math.rsqrt %40 : vector<1x128xf32>
      %42 = arith.mulf %38, %41 : vector<1x128xf32>
      %c0_29 = arith.constant 0 : index
      %c0_30 = arith.constant 0 : index
      %43 = vector.load %arg6[%c0_29, %c0_30] : memref<1x128xf32, #tpu.memory_space<vmem>>, vector<1x128xf32>
      tpu.vector_store %arg6[%c0_29, %c0_30], %42 {strides = array<i32>} : memref<1x128xf32, #tpu.memory_space<vmem>>, vector<1x128xf32>,
      %c0_31 = arith.constant 0 : index
      %c0_32 = arith.constant 0 : index
      %44 = vector.load %arg5[%c0_31, %c0_32] : memref<1x128xf32, #tpu.memory_space<vmem>>, vector<1x128xf32>
      %45 = arith.mulf %30, %42 : vector<1x128xf32>
      %46 = arith.subf %44, %45 : vector<1x128xf32>
      %c0_33 = arith.constant 0 : index
      %c0_34 = arith.constant 0 : index
      %47 = vector.load %arg7[%c0_33, %c0_34] : memref<1x128xf32, #tpu.memory_space<vmem>>, vector<1x128xf32>
      tpu.vector_store %arg7[%c0_33, %c0_34], %46 {strides = array<i32>} : memref<1x128xf32, #tpu.memory_space<vmem>>, vector<1x128xf32>,
    } else {
    }
    return
  }
  func.func @transform_0(%arg0: i32) -> (i32, i32) {
    %c0_i32 = arith.constant 0 : i32
    %c0_i32_0 = arith.constant 0 : i32
    return %arg0, %c0_i32 : i32, i32
  }
  func.func @transform_1(%arg0: i32) -> (i32, i32) {
    %c0_i32 = arith.constant 0 : i32
    %c0_i32_0 = arith.constant 0 : i32
    %c0_i32_1 = arith.constant 0 : i32
    return %c0_i32, %c0_i32_0 : i32, i32
  }
  func.func @transform_2(%arg0: i32) -> (i32, i32) {
    %c0_i32 = arith.constant 0 : i32
    %c0_i32_0 = arith.constant 0 : i32
    %c0_i32_1 = arith.constant 0 : i32
    return %c0_i32, %c0_i32_0 : i32, i32
  }
  func.func @transform_3(%arg0: i32) -> (i32, i32) {
    %c0_i32 = arith.constant 0 : i32
    %c0_i32_0 = arith.constant 0 : i32
    %c0_i32_1 = arith.constant 0 : i32
    return %c0_i32, %c0_i32_0 : i32, i32
  }
  func.func @transform_4(%arg0: i32) -> (i32, i32) {
    %c0_i32 = arith.constant 0 : i32
    %c0_i32_0 = arith.constant 0 : i32
    %c0_i32_1 = arith.constant 0 : i32
    return %c0_i32, %c0_i32_0 : i32, i32
  }
  func.func @transform_5(%arg0: i32) -> (i32, i32) {
    %c0_i32 = arith.constant 0 : i32
    %c0_i32_0 = arith.constant 0 : i32
    %c0_i32_1 = arith.constant 0 : i32
    return %c0_i32, %c0_i32_0 : i32, i32
  }
  func.func @transform_6(%arg0: i32) -> (i32, i32) {
    %c0_i32 = arith.constant 0 : i32
    %c0_i32_0 = arith.constant 0 : i32
    %c0_i32_1 = arith.constant 0 : i32
    return %c0_i32, %c0_i32_0 : i32, i32
  }
}

</mosaic_0001>

<bundles_post_ra>
// kernel: tpu_custom_call.1
= control target key start
LH: loop header
LB: loop body
LE: loop exit
PB: predicated region body
PF: predicated region fallthrough
CT: control target
= control target key end

     0   :  { %12 = vsyncpa [#allocation5], 0  ;;  %s615_s0 = inlined_call_operand.hbm [shape: f32[8,128], index: 0, kind: input, shape index: {}]   ;;  %s616_s1 = inlined_call_operand.hbm [shape: f32[128,128], index: 1, kind: input, shape index: {}]   ;;  %s617_s2 = inlined_call_operand.vmem [shape: f32[1,128], index: 2, kind: input, shape index: {}]   ;;  %s618_s3 = inlined_call_operand.vmem [shape: f32[1,128], index: 3, kind: input, shape index: {}]   ;;  %s619_s4 = inlined_call_operand.vmem [shape: f32[1,128], index: 4, kind: input, shape index: {}]   ;;  %s620_s5 = inlined_call_operand.hbm [shape: f32[1,128], index: 5, kind: output, shape index: {0}]   ;;  %s621_s6 = inlined_call_operand.hbm [shape: f32[1,128], index: 6, kind: output, shape index: {1}]  }
   0x1   :  { %13 = vsyncpa [#allocation8], 0 }
   0x2   :  { %14 = vsyncpa [#allocation6], 0 }
   0x3   :  { %15 = vsyncpa [#allocation11], 0  ;;  %s526_s21 = smov [#allocation4]   ;;  %s527_s23 = smov [#allocation7]  }
   0x4   :  { %s22_s22 = sshll.u32 %s526_s21, 4  ;;  %s31_s24 = sshll.u32 %s527_s23, 4  ;;  %s23_s22 = int_to_ptr.vmem [resolvable:$true] %s22_s22  ;;  %s32_s24 = int_to_ptr.vmem [resolvable:$true] %s31_s24 }
   0x5   :  { %s446_s25 = scalar_lea.vmem %s23_s22, 128  ;;  %p451_p1 = scmp.lt.s32.totalorder %s23_s22, %s23_s22 }
   0x6   :  { %p447_p0 = scmp.ne.s32.totalorder %s23_s22, %s446_s25  ;;  %p452_p2 = scmp.lt.s32.totalorder %s446_s25, %s446_s25 }
   0x8   :  { %p453_p3 = por %p452_p2, %p451_p1 }
   0xa   :  { %p454_p4 = pnand %p453_p3, %p447_p0 }
   0xc   :  { %457 = shalt.err (!%p454_p4)
}
   0xd   :  { %25 = dma.hbm_to_vmem [thread:$0]  %s615_s0, 128, %s23_s22, [#allocation5]  }
   0xe   :  { %s466_s28 = scalar_lea.vmem %s32_s24, 2048  ;;  %p471_p6 = scmp.lt.s32.totalorder %s32_s24, %s32_s24 }
   0xf   :  { %p467_p5 = scmp.ne.s32.totalorder %s32_s24, %s466_s28  ;;  %p472_p7 = scmp.lt.s32.totalorder %s466_s28, %s466_s28 }
  0x11   :  { %p473_p8 = por %p472_p7, %p471_p6 }
  0x13   :  { %p474_p9 = pnand %p473_p8, %p467_p5 }
  0x15   :  { %477 = shalt.err (!%p474_p9)
}
  0x16   :  { %s528_s29 = smov 128   ;;  %s529_s30 = smov 8  }
  0x17   :  { %37 = dma.hbm_to_vmem [thread:$0]  %s616_s1, 2048, %s32_s24, [#allocation8], %s528_s29, %s528_s29, %s529_s30  }
  0x18   :  { %518 = dma.done.wait [#allocation5], 128  }
  0x19   :  { %519 = vsyncadd [#allocation5], 4294967168 }
  0x1a   :  { %520 = dma.done.wait [#allocation8], 2048  }
  0x1b   :  { %521 = vsyncadd [#allocation8], 4294965248  ;;  %v530_v0 = vmov 0.0   ;;  %vm531_vm0 = vmmov 0   ;;  %v72_v1 = vld [vmem:[#allocation7 + $0x78] sm:$0xff]  ;;  %v71_v2 = vld [vmem:[#allocation7 + $0x70] sm:$0xff]  ;;  %v150_v18 = vlaneseq }
  0x1c   :  { %383 = vmatprep.subr.mxu0 %v530_v0  ;;  %415 = vmatprep.mubr.msk.f32.mxu0 %vm531_vm0, %v530_v0  ;;  %v70_v3 = vld [vmem:[#allocation7 + $0x68] sm:$0xff]  ;;  %v69_v4 = vld [vmem:[#allocation7 + $0x60] sm:$0xff]  ;;  %v68_v5 = vld [vmem:[#allocation7 + $0x58] sm:$0xff]  ;;  %vm159_vm2 = vcmask 64512   ;;  %s532_s10 = smov [#allocation9]   ;;  %s533_s14 = smov [#allocation10]  }
  0x1d   :  { %418 = vmatprep.subr.mxu1 %v530_v0  ;;  %420 = vmatprep.mubr.msk.f32.mxu1 %vm531_vm0, %v530_v0  ;;  %v67_v6 = vld [vmem:[#allocation7 + $0x50] sm:$0xff]  ;;  %v66_v7 = vld [vmem:[#allocation7 + $0x48] sm:$0xff]  ;;  %v65_v8 = vld [vmem:[#allocation7 + $0x40] sm:$0xff]  ;;  %v151_v19 = vand.u32 127, %v150_v18  ;;  %s334_s11 = sshll.u32 %s532_s10, 4  ;;  %s344_s15 = sshll.u32 %s533_s14, 4  ;;  %s335_s11 = int_to_ptr.vmem [resolvable:$true] %s334_s11  ;;  %s345_s15 = int_to_ptr.vmem [resolvable:$true] %s344_s15 }
  0x1e   :  { %384 = vmatpush3.msra.mxu0 %v72_v1  ;;  %v64_v9 = vld [vmem:[#allocation7 + $0x38] sm:$0xff]  ;;  %v63_v10 = vld [vmem:[#allocation7 + $0x30] sm:$0xff]  ;;  %v62_v11 = vld [vmem:[#allocation7 + $0x28] sm:$0xff]  ;;  %s478_s16 = scalar_lea.vmem %s335_s11, 16  ;;  %s482_s17 = scalar_lea.vmem %s335_s11, 32 }
  0x1f   :  { %385 = vmatprep.subr.mxu0 %v530_v0  ;;  %v61_v12 = vld [vmem:[#allocation7 + $0x20] sm:$0xff]  ;;  %v60_v13 = vld [vmem:[#allocation7 + $0x18] sm:$0xff]  ;;  %v59_v14 = vld [vmem:[#allocation7 + $0x10] sm:$0xff]  ;;  %vm155_vm1 = vcmp.lt.s32.totalorder %v151_v19, 8  ;;  %p479_p10 = scmp.ne.s32.totalorder %s335_s11, %s478_s16  ;;  %p483_p11 = scmp.lt.s32.totalorder %s335_s11, %s335_s11 }
  0x20   :  { %386 = vmatpush3.msra.mxu0 %v71_v2  ;;  %v58_v15 = vld [vmem:[#allocation7 + $0x8] sm:$0xff]  ;;  %v57_v16 = vld [vmem:[#allocation7] sm:$0xff]  ;;  %v56_v17 = vld [vmem:[#allocation4] sm:$0xff]  ;;  %v359_v23 = vsel %vm155_vm1, 1.0, %v530_v0  ;;  %p484_p12 = scmp.lt.s32.totalorder %s482_s17, %s478_s16 }
  0x21   :  { %387 = vmatprep.subr.mxu0 %v530_v0  ;;  %v358_v20 = vld [vmem:[%s617_s2] ss:$0 sm:$0xff] }
  0x22   :  { %388 = vmatpush3.msra.mxu0 %v70_v3  ;;  %v319_v38 = vld [vmem:[%s618_s3] sm:$0x1]  ;;  %p485_p13 = por %p484_p12, %p483_p11 }
  0x23   :  { %389 = vmatprep.subr.mxu0 %v530_v0  ;;  %v324_v41 = vld [vmem:[%s619_s4] sm:$0x1] }
  0x24   :  { %390 = vmatpush3.msra.mxu0 %v69_v4  ;;  %p486_p0 = pnand %p485_p13, %p479_p10 }
  0x25   :  { %391 = vmatprep.subr.mxu0 %v530_v0 }
  0x26   :  { %392 = vmatpush3.msra.mxu0 %v68_v5 }
  0x27   :  { %393 = vmatprep.subr.mxu0 %v530_v0 }
  0x28   :  { %394 = vmatpush3.msra.mxu0 %v67_v6 }
  0x29   :  { %395 = vmatprep.subr.mxu0 %v530_v0 }
  0x2a   :  { %396 = vmatpush3.msra.mxu0 %v66_v7 }
  0x2b   :  { %397 = vmatprep.subr.mxu0 %v530_v0 }
  0x2c   :  { %398 = vmatpush3.msra.mxu0 %v65_v8 }
  0x2d   :  { %399 = vmatprep.subr.mxu0 %v530_v0 }
  0x2e   :  { %400 = vmatpush3.msra.mxu0 %v64_v9 }
  0x2f   :  { %401 = vmatprep.subr.mxu0 %v530_v0 }
  0x30   :  { %402 = vmatpush3.msra.mxu0 %v63_v10 }
  0x31   :  { %403 = vmatprep.subr.mxu0 %v530_v0 }
  0x32   :  { %404 = vmatpush3.msra.mxu0 %v62_v11 }
  0x33   :  { %405 = vmatprep.subr.mxu0 %v530_v0 }
  0x34   :  { %406 = vmatpush3.msra.mxu0 %v61_v12 }
  0x35   :  { %407 = vmatprep.subr.mxu0 %v530_v0 }
  0x36   :  { %408 = vmatpush3.msra.mxu0 %v60_v13 }
  0x37   :  { %409 = vmatprep.subr.mxu0 %v530_v0 }
  0x38   :  { %410 = vmatpush3.msra.mxu0 %v59_v14 }
  0x39   :  { %411 = vmatprep.subr.mxu0 %v530_v0 }
  0x3a   :  { %412 = vmatpush3.msra.mxu0 %v58_v15 }
  0x3b   :  { %413 = vmatprep.subr.mxu0 %v530_v0 }
  0x3c   :  { %414 = vmatpush3.msra.mxu0 %v57_v16 }
  0x3d   :  { %416 = vmatmul.mubr.f32.vlgmr.msra.gmra.mxu0 %v56_v17 }
  0xfd   :  { %v146_v21 = vpop.f32.mrf.mxu0 }
  0xfe   :  { %v147_v22 = vadd.f32 %v358_v20, %v146_v21 }
  0xff   :  { %v417_v24 = vpop.f32.mrf.mxu0 }
 0x100   :  { %v236_v25 = vmul.f32 %v147_v22, %v147_v22  ;;  %419 = vmatpush3.msra.mxu1 %v147_v22 }
 0x101   :  { %421 = vmatmul.mubr.msk.f32.vlgmr.msra.gmra.mxu1 %vm159_vm2, %v359_v23  ;;  %423 = vmatprep.subr.mxu1 %v530_v0 }
 0x102   :  { %424 = vmatpush3.msra.mxu1 %v236_v25  ;;  %425 = vmatprep.mubr.msk.f32.mxu1 %vm531_vm0, %v530_v0 }
 0x105   :  { %426 = vmatmul.mubr.msk.f32.vlgmr.msra.gmra.mxu1 %vm159_vm2, %v359_v23 }
 0x1c1   :  { %v229_v26 = vpop.f32.mrf.mxu1 }
 0x1c2   :  { %234 = vst [vmem:[#allocation2] sm:$0xff] %v229_v26 }
 0x1c3   :  { %v422_v27 = vpop.f32.mrf.mxu1 }
 0x1c5   :  { %v303_v28 = vpop.f32.mrf.mxu1 }
 0x1c6   :  { %308 = vst [vmem:[#allocation3] sm:$0xff] %v303_v28 }
 0x1c7   :  { %v427_v29 = vpop.f32.mrf.mxu1 }
 0x1c9   :  { %v312_v30 = vld [vmem:[#allocation2] sm:$0x1] }
 0x1ca   :  { %v313_v31 = vmul.f32 0.125, %v312_v30 }
 0x1cc   :  { %v315_v32 = vmul.f32 8.0, %v313_v31 }
 0x1cd   :  { %v314_v33 = vld [vmem:[#allocation3] sm:$0x1] }
 0x1ce   :  { %v316_v34 = vmul.f32 %v315_v32, %v313_v31 }
 0x1d0   :  { %v317_v35 = vsub.f32 %v314_v33, %v316_v34 }
 0x1d2   :  { %v318_v36 = vmul.f32 0.14285715, %v317_v35 }
 0x1d4   :  { %v320_v37 = vadd.f32 1e-05, %v318_v36 }
 0x1d6   :  { %436 = vrsqrt.f32 %v320_v37 }
 0x1e3   :  { %v437_v39 = vpop.eup %436 }
 0x1e4   :  { %v322_v40 = vmul.f32 %v437_v39, %v319_v38 }
 0x1e6   :  { %323 = vst [vmem:[#allocation9] sm:$0x1] %v322_v40  ;;  %v325_v42 = vmul.f32 %v322_v40, %v313_v31 }
 0x1e7   :  { %489 = shalt.err (!%p486_p0)
}
 0x1e8   :  { %337 = dma.vmem_to_hbm [thread:$0]  %s335_s11, 16, %s620_s5, [#allocation6]   ;;  %v326_v43 = vsub.f32 %v324_v41, %v325_v42 }
 0x1e9   :  { %s498_s4 = scalar_lea.vmem %s345_s15, 16  ;;  %s502_s19 = scalar_lea.vmem %s345_s15, 32 }
 0x1ea   :  { %327 = vst [vmem:[#allocation10] sm:$0x1] %v326_v43  ;;  %p499_p1 = scmp.ne.s32.totalorder %s345_s15, %s498_s4  ;;  %p503_p2 = scmp.lt.s32.totalorder %s345_s15, %s345_s15 }
 0x1eb   :  { %p504_p3 = scmp.lt.s32.totalorder %s502_s19, %s498_s4 }
 0x1ed   :  { %p505_p4 = por %p504_p3, %p503_p2 }
 0x1ef   :  { %p506_p5 = pnand %p505_p4, %p499_p1 }
 0x1f1   :  { %509 = shalt.err (!%p506_p5)
}
 0x1f2   :  { %347 = dma.vmem_to_hbm [thread:$0]  %s345_s15, 16, %s621_s6, [#allocation11]  }
 0x1f3   :  { %522 = dma.done.wait [#allocation6], 16  }
 0x1f4   :  { %523 = vsyncadd [#allocation6], 4294967280 }
 0x1f5   :  { %524 = dma.done.wait [#allocation11], 16  }
 0x1f6   :  { %525 = vsyncadd [#allocation11], 4294967280 }
 0x1f7   :  { %354 = vsyncpa [#allocation5], 1 }
 0x1f8   :  { %355 = vsyncpa [#allocation8], 1 }
 0x1f9   :  { %356 = vsyncpa [#allocation6], 1 }
 0x1fa   :  { %357 = vsyncpa [#allocation11], 1 }

</bundles_post_ra>
